<compile_context>
chip_gen: v7x
topology: tpu7x:2x2x1
jax: 0.10.0
libtpu: 0.0.40
codegen_flags: <defaults>
</compile_context>

<pallas_src>
import functools

import jax
import jax.numpy as jnp
from jax.experimental import pallas as pl
from jax.experimental.pallas import tpu as pltpu


def _fmap_kernel(x_ref, ws_ref, bs_ref, wsin_ref, wcos_ref, bm_ref, o_ref):
    # x_ref   : (tile, in_dim)  input rows (natural row-major layout)
    # ws_ref  : (b8, in_dim)    L_s weight in PyTorch (out, in) layout,
    #                           basis dim zero-padded to a multiple of 8
    # bs_ref  : (b8, 1)         L_s bias as a column (zero-padded)
    # wsin_ref: (1, b8)         first  half of L_m weight (sin part)
    # wcos_ref: (1, b8)         second half of L_m weight (cos part)
    # bm_ref  : (1,)  SMEM      L_m bias (scalar)
    # o_ref   : (1, tile)       per-row outputs, lane-dense
    x = x_ref[...]

    # sT[k, r] = sum_j W_s[k, j] * x[r, j] + b_s[k]   -> (b8, tile)
    # Contract both last dims (flash-attn q @ k^T pattern): no transpose op,
    # and all downstream per-row work keeps rows on the 128-wide lane axis.
    sT = jax.lax.dot_general(
        ws_ref[...], x,
        dimension_numbers=(((1,), (1,)), ((), ())),
        preferred_element_type=jnp.float32,
    ) + bs_ref[...]

    sin_t = jnp.sin(sT)
    cos_t = jnp.cos(sT)
    # Padded basis rows: w_s/b_s rows are 0 -> sT = 0 -> sin = 0 (killed by 0
    # weight) and cos = 1 * 0 weight, so padding contributes exactly 0.

    out = (
        jnp.dot(wsin_ref[...], sin_t, preferred_element_type=jnp.float32)
        + jnp.dot(wcos_ref[...], cos_t, preferred_element_type=jnp.float32)
        + bm_ref[0]
    )
    o_ref[...] = out.astype(o_ref.dtype)


def _round_up(v, m):
    return ((v + m - 1) // m) * m


@functools.partial(jax.jit, static_argnames=("tile_m",))
def fmap_forward(x, w_s, b_s, w_m, b_m, *, tile_m=16384):
    """x: (..., in_dim) -> (..., 1), matching the PyTorch Fmap forward.

    Parameters are in PyTorch nn.Linear layout:
      w_s: (basis_dim, in_dim), b_s: (basis_dim,),
      w_m: (1, 2*basis_dim),    b_m: (1,)
    """
    *lead, in_dim = x.shape
    rows = 1
    for d in lead:
        rows *= d
    out_dtype = x.dtype
    x2 = x.reshape(rows, in_dim).astype(jnp.float32)

    basis_dim = w_s.shape[0]
    b8 = _round_up(basis_dim, 8)              # pad basis dim to a sublane multiple
    pad_b = b8 - basis_dim

    ws_p = jnp.pad(w_s.astype(jnp.float32), ((0, pad_b), (0, 0)))         # (b8, in_dim)
    bs_p = jnp.pad(b_s.astype(jnp.float32), (0, pad_b)).reshape(b8, 1)    # (b8, 1)
    w_sin = jnp.pad(w_m[0, :basis_dim].astype(jnp.float32),
                    (0, pad_b)).reshape(1, b8)                            # (1, b8)
    w_cos = jnp.pad(w_m[0, basis_dim:].astype(jnp.float32),
                    (0, pad_b)).reshape(1, b8)                            # (1, b8)
    bm = b_m.reshape(1).astype(jnp.float32)                               # SMEM scalar

    # Adaptive row tile (trace-time Python ints): big enough to amortise the
    # ~0.35 us per-grid-step overhead for large inputs, small enough not to
    # waste compute on tiny ones.  512 satisfies the (8, 128) block rules.
    tile = max(512, min(tile_m, _round_up(max(rows, 1), 512)))
    num_tiles = max((rows + tile - 1) // tile, 1)
    rows_p = num_tiles * tile
    x_p = jnp.pad(x2, ((0, rows_p - rows), (0, 0)))   # padded rows computed, discarded

    out_row = pl.pallas_call(
        _fmap_kernel,
        out_shape=jax.ShapeDtypeStruct((1, rows_p), out_dtype),
        grid_spec=pltpu.PrefetchScalarGridSpec(
            num_scalar_prefetch=0,
            grid=(num_tiles,),
            in_specs=[
                pl.BlockSpec((tile, in_dim), lambda i: (i, 0)),     # x row tile
                pl.BlockSpec((b8, in_dim), lambda i: (0, 0)),       # W_s (resident)
                pl.BlockSpec((b8, 1), lambda i: (0, 0)),            # b_s column
                pl.BlockSpec((1, b8), lambda i: (0, 0)),            # w_m sin half
                pl.BlockSpec((1, b8), lambda i: (0, 0)),            # w_m cos half
                pl.BlockSpec(memory_space=pltpu.MemorySpace.SMEM),  # b_m scalar
            ],
            out_specs=pl.BlockSpec((1, tile), lambda i: (0, i)),    # lane-dense
        ),
        compiler_params=pltpu.CompilerParams(
            dimension_semantics=("parallel",),
        ),
    )(x_p, ws_p, bs_p, w_sin, w_cos, bm)

    return out_row[0, :rows].reshape(*lead, 1)


def _init_params(key, in_dim, basis_dim, dtype=jnp.float32):
    """Deterministic init matching nn.Linear's U(-1/sqrt(fan_in), 1/sqrt(fan_in)),
    stored in PyTorch (out_features, in_features) layout."""
    k1, k2, k3, k4 = jax.random.split(key, 4)
    lim_s = 1.0 / jnp.sqrt(in_dim)
    lim_m = 1.0 / jnp.sqrt(2 * basis_dim)
    w_s = jax.random.uniform(k1, (basis_dim, in_dim), dtype, -lim_s, lim_s)
    b_s = jax.random.uniform(k2, (basis_dim,), dtype, -lim_s, lim_s)
    w_m = jax.random.uniform(k3, (1, 2 * basis_dim), dtype, -lim_m, lim_m)
    b_m = jax.random.uniform(k4, (1,), dtype, -lim_m, lim_m)
    return w_s, b_s, w_m, b_m


def _reference(x, w_s, b_s, w_m, b_m):
    s = x @ w_s.T + b_s
    feats = jnp.concatenate([jnp.sin(s), jnp.cos(s)], axis=-1)
    return feats @ w_m.T + b_m


if __name__ == "__main__":
    in_dim = 32
    basis_dim = 7

    key = jax.random.PRNGKey(0)
    kx1, kx2, kp = jax.random.split(key, 3)
    w_s, b_s, w_m, b_m = _init_params(kp, in_dim, basis_dim)

    # Small case: rows = 16 -> single 512-row tile, exercises row padding.
    x_small = jax.random.normal(kx1, (2, 8, in_dim), dtype=jnp.float32)
    out_small = jax.block_until_ready(fmap_forward(x_small, w_s, b_s, w_m, b_m))
    ref_small = _reference(x_small, w_s, b_s, w_m, b_m)
    assert out_small.shape == (2, 8, 1), out_small.shape
    assert jnp.allclose(out_small, ref_small, atol=1e-4, rtol=1e-4), "small mismatch"

    # Larger case: rows = 2100 -> tile 2560, single grid step, padded rows dropped.
    x_big = jax.random.normal(kx2, (3, 700, in_dim), dtype=jnp.float32)
    out_big = jax.block_until_ready(fmap_forward(x_big, w_s, b_s, w_m, b_m))
    ref_big = _reference(x_big, w_s, b_s, w_m, b_m)
    assert out_big.shape == (3, 700, 1), out_big.shape
    assert jnp.allclose(out_big, ref_big, atol=1e-4, rtol=1e-4), "big mismatch"

    # Multi-tile case: rows = 40960 -> tile 16384, grid of 3 parallel steps.
    x_huge = jax.random.normal(kp, (40, 1024, in_dim), dtype=jnp.float32)
    out_huge = jax.block_until_ready(fmap_forward(x_huge, w_s, b_s, w_m, b_m))
    ref_huge = _reference(x_huge, w_s, b_s, w_m, b_m)
    assert out_huge.shape == (40, 1024, 1), out_huge.shape
    assert jnp.allclose(out_huge, ref_huge, atol=1e-4, rtol=1e-4), "huge mismatch"

    print("KERNEL_OK")
</pallas_src>

<mosaic_0001>
module attributes {stable_mosaic.version = 11 : i64} {
  func.func @_fmap_kernel(%arg0: i32, %arg1: memref<512x32xf32, #tpu.memory_space<vmem>>, %arg2: memref<8x32xf32, #tpu.memory_space<vmem>>, %arg3: memref<8x1xf32, #tpu.memory_space<vmem>>, %arg4: memref<1x8xf32, #tpu.memory_space<vmem>>, %arg5: memref<1x8xf32, #tpu.memory_space<vmem>>, %arg6: memref<1xf32, #tpu.memory_space<smem>>, %arg7: memref<1x512xf32, #tpu.memory_space<vmem>>) attributes {dimension_semantics = [#tpu.dimension_semantics<parallel>], iteration_bounds = array<i64: 1>, scalar_prefetch = 0 : i64, scratch_operands = 0 : i64, tpu.core_type = #tpu.core_type<tc>, window_params = [{transform_indices = @transform_0, window_bounds = array<i64: 512, 32>}, {pipeline_mode = #tpu.pipeline_mode<synchronous>, transform_indices = @transform_1, window_bounds = array<i64: 8, 32>}, {pipeline_mode = #tpu.pipeline_mode<synchronous>, transform_indices = @transform_2, window_bounds = array<i64: 8, 1>}, {pipeline_mode = #tpu.pipeline_mode<synchronous>, transform_indices = @transform_3, window_bounds = array<i64: 1, 8>}, {pipeline_mode = #tpu.pipeline_mode<synchronous>, transform_indices = @transform_4, window_bounds = array<i64: 1, 8>}, {transform_indices = @transform_5, window_bounds = array<i64: 1>}, {transform_indices = @transform_6, window_bounds = array<i64: 1, 512>}]} {
    %c0 = arith.constant 0 : index
    %c0_0 = arith.constant 0 : index
    %0 = vector.load %arg1[%c0, %c0_0] : memref<512x32xf32, #tpu.memory_space<vmem>>, vector<512x32xf32>
    %c0_1 = arith.constant 0 : index
    %c0_2 = arith.constant 0 : index
    %1 = vector.load %arg2[%c0_1, %c0_2] : memref<8x32xf32, #tpu.memory_space<vmem>>, vector<8x32xf32>
    %cst = arith.constant dense<0.000000e+00> : vector<8x512xf32>
    %2 = tpu.matmul %1, %0, %cst {dimension_numbers = #tpu.dot_dimension_numbers<[1], [1], [0], [0], [0, 0, 1, 0], [], []>} : vector<8x32xf32>, vector<512x32xf32>, vector<8x512xf32> -> vector<8x512xf32>
    %c0_3 = arith.constant 0 : index
    %c0_4 = arith.constant 0 : index
    %3 = vector.load %arg3[%c0_3, %c0_4] : memref<8x1xf32, #tpu.memory_space<vmem>>, vector<8x1xf32>
    %4 = vector.broadcast %3 : vector<8x1xf32> to vector<8x512xf32>
    %5 = arith.addf %2, %4 : vector<8x512xf32>
    %6 = math.sin %5 : vector<8x512xf32>
    %7 = math.cos %5 : vector<8x512xf32>
    %c0_5 = arith.constant 0 : index
    %c0_6 = arith.constant 0 : index
    %8 = vector.load %arg4[%c0_5, %c0_6] : memref<1x8xf32, #tpu.memory_space<vmem>>, vector<1x8xf32>
    %cst_7 = arith.constant dense<0.000000e+00> : vector<1x512xf32>
    %9 = tpu.matmul %8, %6, %cst_7 {dimension_numbers = #tpu.dot_dimension_numbers<[1], [0], [0], [1], [0, 0, 1, 1], [], []>} : vector<1x8xf32>, vector<8x512xf32>, vector<1x512xf32> -> vector<1x512xf32>
    %c0_8 = arith.constant 0 : index
    %c0_9 = arith.constant 0 : index
    %10 = vector.load %arg5[%c0_8, %c0_9] : memref<1x8xf32, #tpu.memory_space<vmem>>, vector<1x8xf32>
    %cst_10 = arith.constant dense<0.000000e+00> : vector<1x512xf32>
    %11 = tpu.matmul %10, %7, %cst_10 {dimension_numbers = #tpu.dot_dimension_numbers<[1], [0], [0], [1], [0, 0, 1, 1], [], []>} : vector<1x8xf32>, vector<8x512xf32>, vector<1x512xf32> -> vector<1x512xf32>
    %12 = arith.addf %9, %11 : vector<1x512xf32>
    %c0_11 = arith.constant 0 : index
    %13 = memref.load %arg6[%c0_11] : memref<1xf32, #tpu.memory_space<smem>>
    %14 = vector.broadcast %13 : f32 to vector<1x512xf32>
    %15 = arith.addf %12, %14 : vector<1x512xf32>
    %c0_12 = arith.constant 0 : index
    %c0_13 = arith.constant 0 : index
    %16 = vector.load %arg7[%c0_12, %c0_13] : memref<1x512xf32, #tpu.memory_space<vmem>>, vector<1x512xf32>
    tpu.vector_store %arg7[%c0_12, %c0_13], %15 {strides = array<i32>} : memref<1x512xf32, #tpu.memory_space<vmem>>, vector<1x512xf32>,
    return
  }
  func.func @transform_0(%arg0: i32) -> (i32, i32) {
    %c0_i32 = arith.constant 0 : i32
    %c0_i32_0 = arith.constant 0 : i32
    return %arg0, %c0_i32 : i32, i32
  }
  func.func @transform_1(%arg0: i32) -> (i32, i32) {
    %c0_i32 = arith.constant 0 : i32
    %c0_i32_0 = arith.constant 0 : i32
    %c0_i32_1 = arith.constant 0 : i32
    return %c0_i32, %c0_i32_0 : i32, i32
  }
  func.func @transform_2(%arg0: i32) -> (i32, i32) {
    %c0_i32 = arith.constant 0 : i32
    %c0_i32_0 = arith.constant 0 : i32
    %c0_i32_1 = arith.constant 0 : i32
    return %c0_i32, %c0_i32_0 : i32, i32
  }
  func.func @transform_3(%arg0: i32) -> (i32, i32) {
    %c0_i32 = arith.constant 0 : i32
    %c0_i32_0 = arith.constant 0 : i32
    %c0_i32_1 = arith.constant 0 : i32
    return %c0_i32, %c0_i32_0 : i32, i32
  }
  func.func @transform_4(%arg0: i32) -> (i32, i32) {
    %c0_i32 = arith.constant 0 : i32
    %c0_i32_0 = arith.constant 0 : i32
    %c0_i32_1 = arith.constant 0 : i32
    return %c0_i32, %c0_i32_0 : i32, i32
  }
  func.func @transform_5(%arg0: i32) -> i32 {
    %c0_i32 = arith.constant 0 : i32
    %c0_i32_0 = arith.constant 0 : i32
    return %c0_i32 : i32
  }
  func.func @transform_6(%arg0: i32) -> (i32, i32) {
    %c0_i32 = arith.constant 0 : i32
    %c0_i32_0 = arith.constant 0 : i32
    return %c0_i32, %arg0 : i32, i32
  }
}

</mosaic_0001>

<bundles_post_ra>
// kernel: squeeze.5
= control target key start
LH: loop header
LB: loop body
LE: loop exit
PB: predicated region body
PF: predicated region fallthrough
CT: control target
= control target key end

     0   :  { %s85_s0 = inlined_call_operand.vmem [shape: f32[16], index: 0, kind: input, shape index: {}]   ;;  %s86_s1 = inlined_call_operand.hbm [shape: f32[2,8,1], index: 1, kind: output, shape index: {}]  }
   0x1   :  { %v5_v0 = vld [vmem:[%s85_s0] sm:$0x1] }
   0x2   :  { %2 = vsyncpa [#allocation1], 0  ;;  %6 = vst [vmem:[#allocation3] sm:$0x1] %v5_v0  ;;  %vm8_vm0 = vcmask 64512   ;;  %s58_s0 = smov 120  }
   0x3   :  { %s59_s8 = smov [#allocation0]  }
   0x4   :  { %s26_s9 = sshll.u32 %s59_s8, 4  ;;  %s27_s9 = int_to_ptr.vmem [resolvable:$true] %s26_s9 }
   0x5   :  { %s34_s10 = scalar_lea.vmem %s27_s9, 32  ;;  %p39_p1 = scmp.lt.s32.totalorder %s27_s9, %s27_s9 }
   0x6   :  { %p35_p0 = scmp.ne.s32.totalorder %s27_s9, %s34_s10  ;;  %p40_p2 = scmp.lt.s32.totalorder %s34_s10, %s34_s10 }
   0x8   :  { %p41_p3 = por %p40_p2, %p39_p1 }
   0x9   :  { %v10_v1 = vld [vmem:[#allocation3] sm:$0x1]  }
   0xa   :  { %v7_v2 = vld [vmem:[#allocation3] sm:$0x1]   ;;  %11 = vrot.lane.b32.xlu0 %v10_v1, %s58_s0  ;;  %p42_p4 = pnand %p41_p3, %p35_p0 }
   0xb   :  { %9 = vst.msk [vmem:[#allocation2] sm:$0x1] %vm8_vm0, %v7_v2  }
  0x7c   :  { %v12_v3 = vpop.permute.xlu0 %11  }
  0x7d   :  { %15 = vst.msk [vmem:[#allocation2 + $0x1] sm:$0x1] %vm8_vm0, %v12_v3  }
  0x84   :  { %v19_v4 = vld [vmem:[#allocation2] sm:$0x3] }
  0x85   :  { %21 = vst [vmem:[#allocation0] sm:$0x3] %v19_v4 }
  0x86   :  { %45 = shalt.err (!%p42_p4)
}
  0x87   :  { %s46_s13 = scalar_lea.hbm %s86_s1, 32 }
  0x88   :  { %p47_p5 = scmp.ne.s32.totalorder %s86_s1, %s46_s13  ;;  %p50_p6 = scmp.lt.u32.totalorder %s46_s13, %s86_s1 }
  0x8a   :  { %p52_p7 = pnand %p50_p6, %p47_p5 }
  0x8c   :  { %55 = shalt.err (!%p52_p7)
}
  0x8d   :  { %29 = dma.vmem_to_hbm [thread:$0]  %s27_s9, 32, %s86_s1, [#allocation1]  }
  0x8e   :  { %56 = dma.done.wait [#allocation1], 32  }
  0x8f   :  { %57 = vsyncadd [#allocation1], 4294967264 }
  0x90   :  { %31 = vsyncpa [#allocation1], 1 }

// kernel: fmap_forward.1
= control target key start
LH: loop header
LB: loop body
LE: loop exit
PB: predicated region body
PF: predicated region fallthrough
CT: control target
= control target key end

     0   :  { %vm95_vm0 = vcmask 261120   ;;  %v1910_v3 = vmov 0   ;;  %s2538_s0 = inlined_call_operand.vmem [shape: f32[512,32], index: 0, kind: input, shape index: {}]   ;;  %s2539_s1 = inlined_call_operand.vmem [shape: f32[8,32], index: 1, kind: input, shape index: {}]   ;;  %s2540_s2 = inlined_call_operand.vmem [shape: f32[8,1], index: 2, kind: input, shape index: {}]   ;;  %s2541_s4 = inlined_call_operand.vmem [shape: f32[1,8], index: 4, kind: input, shape index: {}]   ;;  %s2542_s3 = inlined_call_operand.vmem [shape: f32[1,8], index: 3, kind: input, shape index: {}]   ;;  %s2543_s5 = inlined_call_operand.<no memory space> [shape: f32[1], index: 5, kind: input, shape index: {}]   ;;  %s2544_s6 = inlined_call_operand.vmem [shape: f32[1,512], index: 6, kind: output, shape index: {}]  }
   0x1   :  { %v40_v0 = vld [vmem:[%s2538_s0 + $0x80] sm:$0xff]  ;;  %v41_v1 = vld [vmem:[%s2538_s0 + $0x88] sm:$0xff]  ;;  %vm1962_vm1 = vmpackc.low %vm95_vm0, %vm95_vm0  ;;  %1893 = vset.pattern.permute.xlu0 %v1910_v3 }
   0x2   :  { %v1768_v4 = vpack.c.bf16 %v41_v1, %v40_v0  ;;  %v72_v5 = vld [vmem:[%s2538_s0 + $0x180] sm:$0xff]  ;;  %v73_v6 = vld [vmem:[%s2538_s0 + $0x188] sm:$0xff]  ;;  %v42_v14 = vld [vmem:[%s2538_s0 + $0x90] sm:$0xff] }
   0x3   :  { %v24_v7 = vld [vmem:[%s2538_s0] sm:$0xff]  ;;  %v1816_v8 = vpack.c.bf16 %v73_v6, %v72_v5  ;;  %v25_v9 = vld [vmem:[%s2538_s0 + $0x8] sm:$0xff]  ;;  %v43_v15 = vld [vmem:[%s2538_s0 + $0x98] sm:$0xff] }
   0x4   :  { %v56_v10 = vld [vmem:[%s2538_s0 + $0x100] sm:$0xff]  ;;  %v57_v11 = vld [vmem:[%s2538_s0 + $0x108] sm:$0xff]  ;;  %1770 = vmatprep.subr.msk.bf16.mxu0 %vm1962_vm1, %v1768_v4  ;;  %v1771_v12 = vpack.c.bf16 %v25_v9, %v24_v7  ;;  %v74_v16 = vld [vmem:[%s2538_s0 + $0x190] sm:$0xff]  ;;  %v1774_v17 = vpack.c.bf16 %v43_v15, %v42_v14 }
   0x5   :  { %v1819_v13 = vpack.c.bf16 %v57_v11, %v56_v10  ;;  %1818 = vmatprep.subr.msk.bf16.mxu1 %vm1962_vm1, %v1816_v8  ;;  %v75_v18 = vld [vmem:[%s2538_s0 + $0x198] sm:$0xff]  ;;  %v26_v20 = vld [vmem:[%s2538_s0 + $0x10] sm:$0xff]  ;;  %v44_v24 = vld [vmem:[%s2538_s0 + $0xa0] sm:$0xff] }
   0x6   :  { %1773 = vmatpush3.bf16.xpose.msk.msra.mxu0 %vm1962_vm1, %v1771_v12  ;;  %v1822_v19 = vpack.c.bf16 %v75_v18, %v74_v16  ;;  %v27_v21 = vld [vmem:[%s2538_s0 + $0x18] sm:$0xff]  ;;  %v58_v22 = vld [vmem:[%s2538_s0 + $0x110] sm:$0xff]  ;;  %v45_v25 = vld [vmem:[%s2538_s0 + $0xa8] sm:$0xff] }
   0x7   :  { %1821 = vmatpush3.bf16.xpose.msk.msra.mxu1 %vm1962_vm1, %v1819_v13  ;;  %1776 = vmatprep.subr.msk.bf16.mxu0 %vm1962_vm1, %v1774_v17  ;;  %v59_v23 = vld [vmem:[%s2538_s0 + $0x118] sm:$0xff]  ;;  %v76_v26 = vld [vmem:[%s2538_s0 + $0x1a0] sm:$0xff]  ;;  %v77_v27 = vld [vmem:[%s2538_s0 + $0x1a8] sm:$0xff]  ;;  %v1777_v28 = vpack.c.bf16 %v27_v21, %v26_v20  ;;  %v1780_v30 = vpack.c.bf16 %v45_v25, %v44_v24 }
   0x8   :  { %1824 = vmatprep.subr.msk.bf16.mxu1 %vm1962_vm1, %v1822_v19  ;;  %v1825_v29 = vpack.c.bf16 %v59_v23, %v58_v22  ;;  %v1828_v31 = vpack.c.bf16 %v77_v27, %v76_v26  ;;  %v28_v32 = vld [vmem:[%s2538_s0 + $0x20] sm:$0xff]  ;;  %v29_v33 = vld [vmem:[%s2538_s0 + $0x28] sm:$0xff]  ;;  %v46_v36 = vld [vmem:[%s2538_s0 + $0xb0] sm:$0xff] }
   0x9   :  { %v60_v34 = vld [vmem:[%s2538_s0 + $0x120] sm:$0xff]  ;;  %v61_v35 = vld [vmem:[%s2538_s0 + $0x128] sm:$0xff]  ;;  %v47_v37 = vld [vmem:[%s2538_s0 + $0xb8] sm:$0xff]  ;;  %v1783_v40 = vpack.c.bf16 %v29_v33, %v28_v32 }
   0xa   :  { %v78_v38 = vld [vmem:[%s2538_s0 + $0x1b0] sm:$0xff]  ;;  %v79_v39 = vld [vmem:[%s2538_s0 + $0x1b8] sm:$0xff]  ;;  %v1831_v41 = vpack.c.bf16 %v61_v35, %v60_v34  ;;  %v1786_v42 = vpack.c.bf16 %v47_v37, %v46_v36  ;;  %v2080_v47 = vld [vmem:[%s2539_s1] sm:$0xff] }
   0xb   :  { %v1834_v43 = vpack.c.bf16 %v79_v39, %v78_v38  ;;  %v30_v44 = vld [vmem:[%s2538_s0 + $0x30] sm:$0xff]  ;;  %v31_v45 = vld [vmem:[%s2538_s0 + $0x38] sm:$0xff]  ;;  %v48_v49 = vld [vmem:[%s2538_s0 + $0xc0] sm:$0xff]  ;;  %1732 = vmatprep.mubr.msk.f32.mxu0 %vm95_vm0, %v2080_v47  ;;  %1766 = vmatprep.mubr.msk.f32.mxu1 %vm95_vm0, %v2080_v47 }
   0xc   :  { %v62_v46 = vld [vmem:[%s2538_s0 + $0x130] sm:$0xff]  ;;  %v63_v48 = vld [vmem:[%s2538_s0 + $0x138] sm:$0xff]  ;;  %v89_v50 = vld [vmem:[%s2540_s2] sm:$0xff]  ;;  %v1789_v54 = vpack.c.bf16 %v31_v45, %v30_v44 }
   0xd   :  { %v49_v51 = vld [vmem:[%s2538_s0 + $0xc8] sm:$0xff]  ;;  %v80_v52 = vld [vmem:[%s2538_s0 + $0x1c0] sm:$0xff]  ;;  %92 = vperm.xlu0 %1893, %v89_v50   ;;  %v1837_v55 = vpack.c.bf16 %v63_v48, %v62_v46  ;;  %v50_v62 = vld [vmem:[%s2538_s0 + $0xd0] sm:$0xff] }
   0xe   :  { %1779 = vmatpush3.bf16.xpose.msk.msra.mxu0 %vm1962_vm1, %v1777_v28  ;;  %v81_v53 = vld [vmem:[%s2538_s0 + $0x1c8] sm:$0xff]  ;;  %v1792_v56 = vpack.c.bf16 %v49_v51, %v48_v49  ;;  %v32_v58 = vld [vmem:[%s2538_s0 + $0x40] sm:$0xff]  ;;  %v51_v63 = vld [vmem:[%s2538_s0 + $0xd8] sm:$0xff] }
   0xf   :  { %1827 = vmatpush3.bf16.xpose.msk.msra.mxu1 %vm1962_vm1, %v1825_v29  ;;  %1782 = vmatprep.subr.msk.bf16.mxu0 %vm1962_vm1, %v1780_v30  ;;  %v1840_v57 = vpack.c.bf16 %v81_v53, %v80_v52  ;;  %v33_v59 = vld [vmem:[%s2538_s0 + $0x48] sm:$0xff]  ;;  %v64_v60 = vld [vmem:[%s2538_s0 + $0x140] sm:$0xff]  ;;  %v82_v0 = vld [vmem:[%s2538_s0 + $0x1d0] sm:$0xff]  ;;  %v1798_v5 = vpack.c.bf16 %v51_v63, %v50_v62 }
  0x10   :  { %1830 = vmatprep.subr.msk.bf16.mxu1 %vm1962_vm1, %v1828_v31  ;;  %v65_v61 = vld [vmem:[%s2538_s0 + $0x148] sm:$0xff]  ;;  %v83_v1 = vld [vmem:[%s2538_s0 + $0x1d8] sm:$0xff]  ;;  %v1795_v3 = vpack.c.bf16 %v33_v59, %v32_v58  ;;  %v34_v7 = vld [vmem:[%s2538_s0 + $0x50] sm:$0xff] }
  0x11   :  { %v1843_v4 = vpack.c.bf16 %v65_v61, %v64_v60  ;;  %v1846_v6 = vpack.c.bf16 %v83_v1, %v82_v0  ;;  %v35_v8 = vld [vmem:[%s2538_s0 + $0x58] sm:$0xff]  ;;  %v66_v9 = vld [vmem:[%s2538_s0 + $0x150] sm:$0xff]  ;;  %v52_v11 = vld [vmem:[%s2538_s0 + $0xe0] sm:$0xff] }
  0x12   :  { %v67_v10 = vld [vmem:[%s2538_s0 + $0x158] sm:$0xff]  ;;  %v53_v12 = vld [vmem:[%s2538_s0 + $0xe8] sm:$0xff]  ;;  %v84_v13 = vld [vmem:[%s2538_s0 + $0x1e0] sm:$0xff]  ;;  %v1801_v15 = vpack.c.bf16 %v35_v8, %v34_v7 }
  0x13   :  { %v85_v14 = vld [vmem:[%s2538_s0 + $0x1e8] sm:$0xff]  ;;  %v1849_v16 = vpack.c.bf16 %v67_v10, %v66_v9  ;;  %v1804_v17 = vpack.c.bf16 %v53_v12, %v52_v11  ;;  %v36_v19 = vld [vmem:[%s2538_s0 + $0x60] sm:$0xff]  ;;  %v54_v23 = vld [vmem:[%s2538_s0 + $0xf0] sm:$0xff] }
  0x14   :  { %v1852_v18 = vpack.c.bf16 %v85_v14, %v84_v13  ;;  %v37_v20 = vld [vmem:[%s2538_s0 + $0x68] sm:$0xff]  ;;  %v68_v21 = vld [vmem:[%s2538_s0 + $0x160] sm:$0xff]  ;;  %v55_v24 = vld [vmem:[%s2538_s0 + $0xf8] sm:$0xff] }
  0x15   :  { %v69_v22 = vld [vmem:[%s2538_s0 + $0x168] sm:$0xff]  ;;  %v86_v25 = vld [vmem:[%s2538_s0 + $0x1f0] sm:$0xff]  ;;  %v87_v26 = vld [vmem:[%s2538_s0 + $0x1f8] sm:$0xff]  ;;  %v1807_v27 = vpack.c.bf16 %v37_v20, %v36_v19  ;;  %v1810_v29 = vpack.c.bf16 %v55_v24, %v54_v23  ;;  %v1913_v20 = vmov 2131351028  }
  0x16   :  { %1785 = vmatpush3.bf16.xpose.msk.msra.mxu0 %vm1962_vm1, %v1783_v40  ;;  %v1855_v28 = vpack.c.bf16 %v69_v22, %v68_v21  ;;  %v1858_v30 = vpack.c.bf16 %v87_v26, %v86_v25  ;;  %v38_v31 = vld [vmem:[%s2538_s0 + $0x70] sm:$0xff]  ;;  %v39_v32 = vld [vmem:[%s2538_s0 + $0x78] sm:$0xff]  ;;  %v1914_v22 = vmov 2102212464   ;;  %v1915_v24 = vmov 920167782  }
  0x17   :  { %1833 = vmatpush3.bf16.xpose.msk.msra.mxu1 %vm1962_vm1, %v1831_v41  ;;  %1788 = vmatprep.subr.msk.bf16.mxu0 %vm1962_vm1, %v1786_v42  ;;  %v70_v33 = vld [vmem:[%s2538_s0 + $0x170] sm:$0xff]  ;;  %v71_v34 = vld [vmem:[%s2538_s0 + $0x178] sm:$0xff]  ;;  %v1813_v35 = vpack.c.bf16 %v39_v32, %v38_v31  ;;  %v1916_v31 = vmov 1326507024  }
  0x18   :  { %1836 = vmatprep.subr.msk.bf16.mxu1 %vm1962_vm1, %v1834_v43  ;;  %v1861_v36 = vpack.c.bf16 %v71_v34, %v70_v33 }
  0x1e   :  { %1791 = vmatpush3.bf16.xpose.msk.msra.mxu0 %vm1962_vm1, %v1789_v54 }
  0x1f   :  { %1839 = vmatpush3.bf16.xpose.msk.msra.mxu1 %vm1962_vm1, %v1837_v55  ;;  %1794 = vmatprep.subr.msk.bf16.mxu0 %vm1962_vm1, %v1792_v56 }
  0x20   :  { %1842 = vmatprep.subr.msk.bf16.mxu1 %vm1962_vm1, %v1840_v57 }
  0x26   :  { %1797 = vmatpush3.bf16.xpose.msk.msra.mxu0 %vm1962_vm1, %v1795_v3 }
  0x27   :  { %1845 = vmatpush3.bf16.xpose.msk.msra.mxu1 %vm1962_vm1, %v1843_v4  ;;  %1800 = vmatprep.subr.msk.bf16.mxu0 %vm1962_vm1, %v1798_v5 }
  0x28   :  { %1848 = vmatprep.subr.msk.bf16.mxu1 %vm1962_vm1, %v1846_v6 }
  0x2e   :  { %1803 = vmatpush3.bf16.xpose.msk.msra.mxu0 %vm1962_vm1, %v1801_v15  ;;  %v1911_v15 = vmov 683565275  }
  0x2f   :  { %1851 = vmatpush3.bf16.xpose.msk.msra.mxu1 %vm1962_vm1, %v1849_v16  ;;  %1806 = vmatprep.subr.msk.bf16.mxu0 %vm1962_vm1, %v1804_v17  ;;  %v1912_v17 = vmov 2475754826  }
  0x30   :  { %1854 = vmatprep.subr.msk.bf16.mxu1 %vm1962_vm1, %v1852_v18 }
  0x36   :  { %1809 = vmatpush3.bf16.xpose.msk.msra.mxu0 %vm1962_vm1, %v1807_v27 }
  0x37   :  { %1857 = vmatpush3.bf16.xpose.msk.msra.mxu1 %vm1962_vm1, %v1855_v28  ;;  %1812 = vmatprep.subr.msk.bf16.mxu0 %vm1962_vm1, %v1810_v29 }
  0x38   :  { %1860 = vmatprep.subr.msk.bf16.mxu1 %vm1962_vm1, %v1858_v30 }
  0x3e   :  { %1815 = vmatpush3.bf16.xpose.msk.msra.mxu0 %vm1962_vm1, %v1813_v35 }
  0x3f   :  { %1863 = vmatpush3.bf16.xpose.msk.msra.mxu1 %vm1962_vm1, %v1861_v36 }
  0x45   :  { %1733 = vmatmul.mubr.msk.f32.vlgmr.msra.gmra.mrb[0].mxu0 %vm95_vm0, %v2080_v47 }
  0x46   :  { %1767 = vmatmul.mubr.msk.f32.vlgmr.msra.gmra.mrb[0].mxu1 %vm95_vm0, %v2080_v47 }
  0x8c   :  { %v93_v37 = vpop.permute.xlu0 %92 }
 0x118   :  { %v357_v38 = vpop.f32.mrb[0].mxu0 }
 0x119   :  { %v428_v39 = vpop.f32.mrb[0].mxu1  ;;  %v2232_v40 = vadd.f32 %v357_v38, %v93_v37  ;;  %v359_v42 = vpop.f32.mrb[1].mxu0 }
 0x11a   :  { %v2234_v41 = vadd.f32 %v428_v39, %v93_v37  ;;  %v430_v43 = vpop.f32.mrb[1].mxu1  ;;  %v2236_v44 = vadd.f32 %v359_v42, %v93_v37 }
 0x11b   :  { %v433_v2 = vand.u32 2147483647, %v2232_v40  ;;  %v436_v45 = vand.u32 2139095040, %v2232_v40  ;;  %v2243_v49 = vadd.f32 %v430_v43, %v93_v37 }
 0x11c   :  { %v641_v46 = vand.u32 2147483647, %v2234_v41  ;;  %v644_v48 = vand.u32 2139095040, %v2234_v41  ;;  %v537_v47 = vand.u32 2147483647, %v2236_v44  ;;  %v540_v52 = vand.u32 2139095040, %v2236_v44 }
 0x11d   :  { %v437_v50 = vshrl.u32 %v436_v45, 23  ;;  %v440_v51 = vand.u32 8388607, %v433_v2  ;;  %v748_v60 = vand.u32 2139095040, %v2243_v49 }
 0x11e   :  { %v645_v53 = vshrl.u32 %v644_v48, 23  ;;  %v648_v54 = vand.u32 8388607, %v641_v46  ;;  %v541_v56 = vshrl.u32 %v540_v52, 23  ;;  %v2252_v59 = vand.u32 8388607, %v537_v47 }
 0x11f   :  { %v1664_v55 = vadd.s32 4294967169, %v437_v50  ;;  %v441_v57 = vor.u32 8388608, %v440_v51  ;;  %v749_v1 = vshrl.u32 %v748_v60, 23 }
 0x120   :  { %v1672_v58 = vadd.s32 4294967169, %v645_v53  ;;  %v1668_v62 = vadd.s32 4294967169, %v541_v56  ;;  %v649_v63 = vor.u32 8388608, %v648_v54  ;;  %v545_v6 = vor.u32 8388608, %v2252_v59 }
 0x121   :  { %v443_v61 = vadd.s32 1, %v1664_v55  ;;  %v2255_v5 = vshll.u32 %v441_v57, 8  ;;  %v2262_v13 = vadd.s32 4294967169, %v749_v1 }
 0x122   :  { %v651_v0 = vadd.s32 1, %v1672_v58  ;;  %v547_v3 = vadd.s32 1, %v1668_v62  ;;  %v2260_v12 = vshll.u32 %v649_v63, 8 }
 0x123   :  { %vm444_vm2 = vcmp.gt.s32.totalorder %v443_v61, 0 }
 0x124   :  { %v445_v4 = vsel %vm444_vm2, %v443_v61, 0  ;;  %vm652_vm3 = vcmp.gt.s32.totalorder %v651_v0, 0  ;;  %vm548_vm4 = vcmp.gt.s32.totalorder %v547_v3, 0 }
 0x125   :  { %v446_v7 = vshrl.u32 %v445_v4, 5  ;;  %v447_v8 = vand.u32 31, %v445_v4  ;;  %v653_v9 = vsel %vm652_vm3, %v651_v0, 0  ;;  %v2266_v19 = vsel %vm548_vm4, %v547_v3, 0 }
 0x126   :  { %v2258_v10 = vshrl.u32 %v653_v9, 5  ;;  %v655_v11 = vand.u32 31, %v653_v9 }
 0x127   :  { %v448_v14 = vsub.s32 32, %v447_v8  ;;  %v450_v16 = vshll.u32 %v1911_v15, %v447_v8  ;;  %v453_v18 = vshll.u32 %v1912_v17, %v447_v8  ;;  %v456_v21 = vshll.u32 %v1913_v20, %v447_v8 }
 0x128   :  { %v459_v23 = vshll.u32 %v1914_v22, %v447_v8  ;;  %v462_v25 = vshll.u32 %v1915_v24, %v447_v8  ;;  %vm465_vm5 = vcmp.lt.s32.totalorder %v446_v7, 1  ;;  %vm466_vm6 = vcmp.lt.s32.totalorder %v446_v7, 2 }
 0x129   :  { %v451_v26 = vshrl.u32 %v1912_v17, %v448_v14  ;;  %v454_v27 = vshrl.u32 %v1913_v20, %v448_v14  ;;  %v457_v28 = vshrl.u32 %v1914_v22, %v448_v14  ;;  %v449_v29 = vshrl.u32 %v1911_v15, %v448_v14 }
 0x12a   :  { %v460_v30 = vshrl.u32 %v1915_v24, %v448_v14  ;;  %v463_v32 = vshrl.u32 %v1916_v31, %v448_v14  ;;  %vm467_vm7 = vcmp.lt.s32.totalorder %v446_v7, 3  ;;  %v656_v36 = vsub.s32 32, %v655_v11 }
 0x12b   :  { %v452_v33 = vor.u32 %v451_v26, %v450_v16  ;;  %v455_v34 = vor.u32 %v454_v27, %v453_v18  ;;  %v458_v35 = vor.u32 %v457_v28, %v456_v21  ;;  %vm468_vm8 = vcmp.lt.s32.totalorder %v446_v7, 4 }
 0x12c   :  { %v461_v37 = vor.u32 %v460_v30, %v459_v23  ;;  %v464_v38 = vor.u32 %v463_v32, %v462_v25  ;;  %v658_v39 = vshll.u32 %v1911_v15, %v655_v11  ;;  %v661_v53 = vshll.u32 %v1912_v17, %v655_v11 }
 0x12d   :  { %v469_v42 = vsel %vm465_vm5, %v449_v29, %v452_v33  ;;  %v470_v43 = vsel %vm468_vm8, %v458_v35, 2102212464  ;;  %v473_v45 = vsel %vm465_vm5, %v452_v33, %v455_v34  ;;  %v477_v48 = vsel %vm465_vm5, %v455_v34, %v458_v35 }
 0x12e   :  { %v471_v50 = vsel %vm467_vm7, %v455_v34, %v470_v43  ;;  %v474_v51 = vsel %vm468_vm8, %v461_v37, 920167782  ;;  %v478_v52 = vsel %vm468_vm8, %v464_v38, 1326507024  ;;  %v657_v56 = vshrl.u32 %v1911_v15, %v656_v36 }
 0x12f   :  { %v475_v54 = vsel %vm467_vm7, %v458_v35, %v474_v51  ;;  %v479_v55 = vsel %vm467_vm7, %v461_v37, %v478_v52  ;;  %v659_v57 = vshrl.u32 %v1912_v17, %v656_v36  ;;  %v472_v58 = vsel %vm466_vm6, %v469_v42, %v471_v50 }
 0x130   :  { %v476_v60 = vsel %vm466_vm6, %v473_v45, %v475_v54  ;;  %v480_v61 = vsel %vm466_vm6, %v477_v48, %v479_v55  ;;  %v662_v62 = vshrl.u32 %v1913_v20, %v656_v36  ;;  %v664_v9 = vshll.u32 %v1913_v20, %v655_v11 }
 0x131   :  { %v2292_v63 = vmul.u32.u64.low %v2255_v5, %v480_v61  ;;  %v2293_v0 = vmul.u32.u64.high %v2255_v5, %v480_v61, %v2292_v63  ;;  %v2296_v1 = vmul.u32.u64.low %v2255_v5, %v476_v60  ;;  %v2297_v3 = vmul.u32.u64.high %v2255_v5, %v476_v60, %v2296_v1 }
 0x132   :  { %v660_v4 = vor.u32 %v659_v57, %v658_v39  ;;  %v663_v8 = vor.u32 %v662_v62, %v661_v53  ;;  %v665_v14 = vshrl.u32 %v1914_v22, %v656_v36  ;;  %v488_v7 = vmul.u32 %v2255_v5, %v472_v58 }
 0x133   :  { %v667_v16 = vshll.u32 %v1914_v22, %v655_v11  ;;  %v668_v18 = vshrl.u32 %v1915_v24, %v656_v36  ;;  %v671_v21 = vshrl.u32 %v1916_v31, %v656_v36  ;;  %v670_v25 = vshll.u32 %v1915_v24, %v655_v11 }
 0x134   :  { %v666_v23 = vor.u32 %v665_v14, %v664_v9  ;;  %vm673_vm9 = vcmp.lt.s32.totalorder %v2258_v10, 1  ;;  %vm674_vm10 = vcmp.lt.s32.totalorder %v2258_v10, 2  ;;  %vm490_vm11 = vc.u32 %v2293_v0, %v2296_v1 }
 0x135   :  { %v491_v26 = vadd.s32 1, %v2297_v3  ;;  %v669_v27 = vor.u32 %v668_v18, %v667_v16  ;;  %vm675_vm12 = vcmp.lt.s32.totalorder %v2258_v10, 3  ;;  %v672_v5 = vor.u32 %v671_v21, %v670_v25 }
 0x136   :  { %vm676_vm13 = vcmp.lt.s32.totalorder %v2258_v10, 4  ;;  %v677_v28 = vsel %vm673_vm9, %v657_v56, %v660_v4  ;;  %v681_v29 = vsel %vm673_vm9, %v660_v4, %v663_v8  ;;  %v685_v33 = vsel %vm673_vm9, %v663_v8, %v666_v23 }
 0x137   :  { %v492_v30 = vsel %vm490_vm11, %v491_v26, %v2297_v3  ;;  %v678_v11 = vsel %vm676_vm13, %v666_v23, 2102212464  ;;  %v682_v32 = vsel %vm676_vm13, %v669_v27, 920167782  ;;  %v686_v37 = vsel %vm676_vm13, %v672_v5, 1326507024 }
 0x138   :  { %v493_v34 = vadd.s32 %v492_v30, %v488_v7  ;;  %v679_v35 = vsel %vm675_vm12, %v663_v8, %v678_v11  ;;  %v683_v36 = vsel %vm675_vm12, %v666_v23, %v682_v32  ;;  %v687_v42 = vsel %vm675_vm12, %v669_v27, %v686_v37 }
 0x139   :  { %v680_v38 = vsel %vm674_vm10, %v677_v28, %v679_v35  ;;  %v684_v39 = vsel %vm674_vm10, %v681_v29, %v683_v36  ;;  %v2320_v43 = vshrl.u32 %v2266_v19, 5  ;;  %v688_v48 = vsel %vm674_vm10, %v685_v33, %v687_v42 }
 0x13a   :  { %v494_v45 = vadd.s32 536870912, %v493_v34  ;;  %v2325_v50 = vmul.u32.u64.low %v2260_v12, %v684_v39  ;;  %v2326_v51 = vmul.u32.u64.high %v2260_v12, %v684_v39, %v2325_v50  ;;  %v551_v54 = vand.u32 31, %v2266_v19 }
 0x13b   :  { %v2330_v52 = vmul.u32.u64.low %v2260_v12, %v688_v48  ;;  %v2331_v53 = vmul.u32.u64.high %v2260_v12, %v688_v48, %v2330_v52  ;;  %v2338_v56 = vshll.u32 %v545_v6, 8  ;;  %v755_v10 = vadd.s32 1, %v2262_v13 }
 0x13c   :  { %v2334_v55 = vshrl.u32 %v494_v45, 30  ;;  %v696_v57 = vmul.u32 %v2260_v12, %v680_v38  ;;  %v552_v58 = vsub.s32 32, %v551_v54  ;;  %v554_v60 = vshll.u32 %v1911_v15, %v551_v54 }
 0x13d   :  { %vm569_vm14 = vcmp.lt.s32.totalorder %v2320_v43, 1  ;;  %v699_v62 = vadd.s32 1, %v2326_v51  ;;  %v557_v19 = vshll.u32 %v1912_v17, %v551_v54  ;;  %v560_v63 = vshll.u32 %v1913_v20, %v551_v54 }
 0x13e   :  { %v496_v61 = vshll.u32 %v2334_v55, 30  ;;  %vm570_vm15 = vcmp.lt.s32.totalorder %v2320_v43, 2  ;;  %vm698_vm0 = vc.u32 %v2331_v53, %v2325_v50  ;;  %v555_v59 = vshrl.u32 %v1912_v17, %v552_v58 }
 0x13f   :  { %v563_v6 = vshll.u32 %v1914_v22, %v551_v54  ;;  %v566_v12 = vshll.u32 %v1915_v24, %v551_v54  ;;  %v700_v3 = vsel %vm698_vm0, %v699_v62, %v2326_v51  ;;  %v558_v4 = vshrl.u32 %v1913_v20, %v552_v58 }
 0x140   :  { %v2354_v13 = vsub.s32 %v493_v34, %v496_v61  ;;  %v561_v8 = vshrl.u32 %v1914_v22, %v552_v58  ;;  %v701_v9 = vadd.s32 %v700_v3, %v696_v57  ;;  %v556_v14 = vor.u32 %v555_v59, %v554_v60 }
 0x141   :  { %v564_v7 = vshrl.u32 %v1915_v24, %v552_v58  ;;  %v567_v16 = vshrl.u32 %v1916_v31, %v552_v58  ;;  %v553_v21 = vshrl.u32 %v1911_v15, %v552_v58  ;;  %v559_v23 = vor.u32 %v558_v4, %v557_v19 }
 0x142   :  { %v499_v18 = vsub.s32 0, %v2354_v13  ;;  %v562_v25 = vor.u32 %v561_v8, %v560_v63  ;;  %v702_v26 = vadd.s32 536870912, %v701_v9  ;;  %vm572_vm1 = vcmp.lt.s32.totalorder %v2320_v43, 4 }
 0x143   :  { %v565_v27 = vor.u32 %v564_v7, %v563_v6  ;;  %v568_v5 = vor.u32 %v567_v16, %v566_v12  ;;  %v577_v30 = vsel %vm569_vm14, %v556_v14, %v559_v23  ;;  %vm571_vm2 = vcmp.lt.s32.totalorder %v2320_v43, 3 }
 0x144   :  { %v1665_v28 = vmin.u32 %v499_v18, %v2354_v13  ;;  %v574_v29 = vsel %vm572_vm1, %v562_v25, 2102212464  ;;  %v581_v11 = vsel %vm569_vm14, %v559_v23, %v562_v25  ;;  %v2369_v32 = vshrl.u32 %v702_v26, 30 }
 0x145   :  { %v578_v33 = vsel %vm572_vm1, %v565_v27, 920167782  ;;  %v582_v34 = vsel %vm572_vm1, %v568_v5, 1326507024  ;;  %v573_v36 = vsel %vm569_vm14, %v553_v21, %v556_v14  ;;  %v575_v42 = vsel %vm571_vm2, %v559_v23, %v574_v29 }
 0x146   :  { %v501_v35 = vclz %v1665_v28  ;;  %v579_v37 = vsel %vm571_vm2, %v562_v25, %v578_v33  ;;  %v583_v38 = vsel %vm571_vm2, %v565_v27, %v582_v34  ;;  %v704_v39 = vshll.u32 %v2369_v32, 30 }
 0x147   :  { %v580_v45 = vsel %vm570_vm15, %v577_v30, %v579_v37  ;;  %v584_v48 = vsel %vm570_vm15, %v581_v11, %v583_v38  ;;  %vm756_vm3 = vcmp.gt.s32.totalorder %v755_v10, 0  ;;  %v745_v62 = vand.u32 2147483647, %v2243_v49 }
 0x148   :  { %v1666_v51 = vadd.s32 4294967294, %v501_v35  ;;  %v2380_v52 = vmul.u32.u64.low %v2338_v56, %v584_v48  ;;  %v2381_v54 = vmul.u32.u64.high %v2338_v56, %v584_v48, %v2380_v52  ;;  %v2383_v57 = vsub.s32 %v701_v9, %v704_v39 }
 0x149   :  { %v2386_v58 = vmul.u32.u64.low %v2338_v56, %v580_v45  ;;  %v2387_v60 = vmul.u32.u64.high %v2338_v56, %v580_v45, %v2386_v58  ;;  %v757_v61 = vsel %vm756_vm3, %v755_v10, 0  ;;  %v576_v6 = vsel %vm570_vm15, %v573_v36, %v575_v42 }
 0x14a   :  { %vm1667_vm4 = vcmp.lt.s32.totalorder %v1666_v51, 0  ;;  %v759_v19 = vand.u32 31, %v757_v61  ;;  %v707_v59 = vsub.s32 0, %v2383_v57  ;;  %v489_v12 = vadd.s32 %v2296_v1, %v2293_v0 }
 0x14b   :  { %v504_v63 = vsel %vm1667_vm4, 0, %v1666_v51  ;;  %vm594_vm5 = vc.u32 %v2381_v54, %v2386_v58  ;;  %v595_v10 = vadd.s32 1, %v2387_v60  ;;  %v592_v7 = vmul.u32 %v2338_v56, %v576_v6 }
 0x14c   :  { %v505_v3 = vsub.s32 32, %v504_v63  ;;  %v509_v4 = vsub.s32 4294967266, %v504_v63  ;;  %v1673_v8 = vmin.u32 %v707_v59, %v2383_v57  ;;  %v760_v9 = vsub.s32 32, %v759_v19 }
 0x14d   :  { %v752_v43 = vand.u32 8388607, %v745_v62  ;;  %v596_v0 = vsel %vm594_vm5, %v595_v10, %v2387_v60  ;;  %v506_v23 = vshll.u32 %v2354_v13, %v504_v63  ;;  %v762_v56 = vshll.u32 %v1911_v15, %v759_v19 }
 0x14e   :  { %v510_v14 = vadd.s32 127, %v509_v4  ;;  %v507_v16 = vshrl.u32 %v489_v12, %v505_v3  ;;  %v709_v18 = vclz %v1673_v8  ;;  %v597_v21 = vadd.s32 %v596_v0, %v592_v7 }
 0x14f   :  { %v763_v26 = vshrl.u32 %v1912_v17, %v760_v9  ;;  %v753_v28 = vor.u32 8388608, %v752_v43  ;;  %v766_v30 = vshrl.u32 %v1913_v20, %v760_v9  ;;  %v769_v34 = vshrl.u32 %v1914_v22, %v760_v9 }
 0x150   :  { %v511_v1 = vshll.u32 %v510_v14, 23  ;;  %v1674_v25 = vadd.s32 4294967294, %v709_v18  ;;  %v598_v5 = vadd.s32 536870912, %v597_v21  ;;  %v508_v29 = vor.u32 %v507_v16, %v506_v23 }
 0x151   :  { %v772_v13 = vshrl.u32 %v1915_v24, %v760_v9  ;;  %v758_v36 = vshrl.u32 %v757_v61, 5  ;;  %v764_v37 = vor.u32 %v763_v26, %v762_v56  ;;  %v765_v38 = vshll.u32 %v1912_v17, %v759_v19 }
 0x152   :  { %v512_v27 = vor.u32 4788187, %v511_v1  ;;  %vm1675_vm6 = vcmp.lt.s32.totalorder %v1674_v25, 0  ;;  %v2410_v33 = vshrl.u32 %v598_v5, 30  ;;  %v768_v42 = vshll.u32 %v1913_v20, %v759_v19 }
 0x153   :  { %v2408_v11 = vsel %vm1675_vm6, 0, %v1674_v25  ;;  %v771_v45 = vshll.u32 %v1914_v22, %v759_v19  ;;  %v775_v48 = vshrl.u32 %v1916_v31, %v760_v9  ;;  %v515_v51 = vcvt.s32.f32 %v508_v29 }
 0x154   :  { %v513_v35 = vand.u32 2147483647, %v512_v27  ;;  %v600_v39 = vshll.u32 %v2410_v33, 30  ;;  %v717_v52 = vsub.s32 4294967266, %v2408_v11  ;;  %v767_v60 = vor.u32 %v766_v30, %v765_v38 }
 0x155   :  { %v774_v63 = vshll.u32 %v1915_v24, %v759_v19  ;;  %v770_v6 = vor.u32 %v769_v34, %v768_v42  ;;  %v773_v61 = vor.u32 %v772_v13, %v771_v45  ;;  %v761_v4 = vshrl.u32 %v1911_v15, %v760_v9 }
 0x156   :  { %v601_v59 = vsub.s32 %v597_v21, %v600_v39  ;;  %v516_v12 = vmul.f32 %v515_v51, %v513_v35  ;;  %vm777_vm7 = vcmp.lt.s32.totalorder %v758_v36, 1  ;;  %v793_v20 = vshll.u32 %v753_v28, 8 }
 0x157   :  { %v776_v3 = vor.u32 %v775_v48, %v774_v63  ;;  %v718_v8 = vadd.s32 127, %v717_v52  ;;  %vm779_vm8 = vcmp.lt.s32.totalorder %v758_v36, 3  ;;  %vm780_vm9 = vcmp.lt.s32.totalorder %v758_v36, 4 }
 0x158   :  { %v603_v17 = vsub.s32 0, %v601_v59  ;;  %v785_v22 = vsel %vm777_vm7, %v764_v37, %v767_v60  ;;  %v782_v10 = vsel %vm780_vm9, %v770_v6, 2102212464  ;;  %v786_v14 = vsel %vm780_vm9, %v773_v61, 920167782 }
 0x159   :  { %v789_v7 = vsel %vm777_vm7, %v767_v60, %v770_v6  ;;  %v517_v43 = vxor.u32 2147483648, %v516_v12  ;;  %vm778_vm10 = vcmp.lt.s32.totalorder %v758_v36, 2  ;;  %v787_v24 = vsel %vm779_vm8, %v770_v6, %v786_v14 }
 0x15a   :  { %v1669_v31 = vmin.u32 %v603_v17, %v601_v59  ;;  %v790_v19 = vsel %vm780_vm9, %v776_v3, 1326507024  ;;  %v781_v18 = vsel %vm777_vm7, %v761_v4, %v764_v37  ;;  %v788_v0 = vsel %vm778_vm10, %v785_v22, %v787_v24 }
 0x15b   :  { %v791_v1 = vsel %vm779_vm8, %v773_v61, %v790_v19  ;;  %v783_v15 = vsel %vm779_vm8, %v767_v60, %v782_v10  ;;  %v2424_v21 = vmul.u32.u64.low %v793_v20, %v788_v0  ;;  %v2425_v23 = vmul.u32.u64.high %v793_v20, %v788_v0, %v2424_v21 }
 0x15c   :  { %v605_v16 = vclz %v1669_v31  ;;  %v792_v9 = vsel %vm778_vm10, %v789_v7, %v791_v1  ;;  %v713_v25 = vsub.s32 32, %v2408_v11  ;;  %vm435_vm11 = vcmp.lt.s32.totalorder %v2232_v40, 0 }
 0x15d   :  { %v2429_v27 = vmul.u32.u64.low %v793_v20, %v792_v9  ;;  %v2430_v5 = vmul.u32.u64.high %v793_v20, %v792_v9, %v2429_v27  ;;  %v697_v28 = vadd.s32 %v2325_v50, %v2331_v53  ;;  %v719_v29 = vshll.u32 %v718_v8, 23 }
 0x15e   :  { %v1670_v26 = vadd.s32 4294967294, %v605_v16  ;;  %v518_v56 = vsel %vm435_vm11, %v517_v43, %v516_v12  ;;  %v784_v30 = vsel %vm778_vm10, %v781_v18, %v783_v15  ;;  %vm2440_vm13 = vcmp.le.f32.partialorder %v433_v2, 0.7853982 }
 0x15f   :  { %v593_v13 = vadd.s32 %v2386_v58, %v2381_v54  ;;  %v803_v37 = vadd.s32 1, %v2425_v23  ;;  %v1917_v50 = vmov 0.0   ;;  %v714_v53 = vshll.u32 %v2383_v57, %v2408_v11 }
 0x160   :  { %vm1671_vm12 = vcmp.lt.s32.totalorder %v1670_v26, 0  ;;  %1331 = vmatprep.mubr.f32.mxu0 %v1917_v50  ;;  %1402 = vmatprep.mubr.f32.mxu1 %v1917_v50  ;;  %v715_v36 = vshrl.u32 %v697_v28, %v713_v25  ;;  %v521_v39 = vsel %vm2440_vm13, %v2232_v40, %v518_v56  ;;  %v720_v42 = vor.u32 4788187, %v719_v29 }
 0x161   :  { %v608_v35 = vsel %vm1671_vm12, 0, %v1670_v26  ;;  %v800_v54 = vmul.u32 %v793_v20, %v784_v30  ;;  %vm802_vm14 = vc.u32 %v2430_v5, %v2424_v21  ;;  %1894 = vsinq.f32 %v521_v39 }
 0x162   :  { %v609_v38 = vsub.s32 32, %v608_v35  ;;  %v613_v2 = vsub.s32 4294967266, %v608_v35  ;;  %v610_v58 = vshll.u32 %v601_v59, %v608_v35  ;;  %v804_v51 = vsel %vm802_vm14, %v803_v37, %v2425_v23 }
 0x163   :  { %v805_v52 = vadd.s32 %v804_v51, %v800_v54  ;;  %v716_v60 = vor.u32 %v715_v36, %v714_v53  ;;  %1896 = vcosq.f32 %v521_v39  ;;  %v721_v6 = vand.u32 2147483647, %v720_v42 }
 0x164   :  { %v611_v45 = vshrl.u32 %v593_v13, %v609_v38  ;;  %v614_v48 = vadd.s32 127, %v613_v2  ;;  %v519_v3 = vsub.s32 4, %v2334_v55  ;;  %v623_v20 = vsub.s32 4, %v2410_v33 }
 0x165   :  { %v806_v63 = vadd.s32 536870912, %v805_v52  ;;  %v723_v17 = vcvt.s32.f32 %v716_v60  ;;  %vm539_vm15 = vcmp.lt.s32.totalorder %v2236_v44, 0  ;;  %vm538_vm0 = vcmp.le.f32.partialorder %v537_v47, 0.7853982 }
 0x166   :  { %v612_v57 = vor.u32 %v611_v45, %v610_v58  ;;  %v615_v11 = vshll.u32 %v614_v48, 23  ;;  %v520_v14 = vsel %vm435_vm11, %v519_v3, %v2334_v55  ;;  %v624_v43 = vsel %vm539_vm15, %v623_v20, %v2410_v33 }
 0x167   :  { %v2457_v12 = vshrl.u32 %v806_v63, 30  ;;  %v724_v22 = vmul.f32 %v723_v17, %v721_v6  ;;  %v522_v18 = vsel %vm2440_vm13, 0, %v520_v14  ;;  %v626_v9 = vsel %vm538_vm0, 0, %v624_v43 }
 0x168   :  { %v616_v61 = vor.u32 4788187, %v615_v11  ;;  %v619_v59 = vcvt.s32.f32 %v612_v57  ;;  %vm643_vm1 = vcmp.lt.s32.totalorder %v2234_v41, 0  ;;  %v942_v33 = vand.u32 3, %v522_v18 }
 0x169   :  { %v808_v8 = vshll.u32 %v2457_v12, 30  ;;  %v725_v19 = vxor.u32 2147483648, %v724_v22  ;;  %v630_v47 = vadd.s32 3, %v626_v9  ;;  %v526_v29 = vadd.s32 3, %v522_v18 }
 0x16a   :  { %v617_v4 = vand.u32 2147483647, %v616_v61  ;;  %vm2477_vm2 = vcmp.le.f32.partialorder %v641_v46, 0.7853982  ;;  %v1045_v30 = vand.u32 3, %v626_v9  ;;  %v801_v13 = vadd.s32 %v2424_v21, %v2430_v5 }
 0x16b   :  { %v809_v10 = vsub.s32 %v805_v52, %v808_v8  ;;  %v1895_v0 = vpop.eup %1894  ;;  %v726_v25 = vsel %vm643_vm1, %v725_v19, %v724_v22  ;;  %vm944_vm4 = vcmp.eq.s32.totalorder %v942_v33, 0  ;;  %vm947_vm5 = vcmp.eq.s32.totalorder %v942_v33, 2 }
 0x16c   :  { %v620_v31 = vmul.f32 %v619_v59, %v617_v4  ;;  %v530_v26 = vxor.u32 2147483648, %v1895_v0  ;;  %v729_v34 = vsel %vm2477_vm2, %v2234_v41, %v726_v25  ;;  %v631_v53 = vand.u32 3, %v630_v47 }
 0x16d   :  { %v811_v24 = vsub.s32 0, %v809_v10  ;;  %v1897_v23 = vpop.eup %1896  ;;  %v527_v2 = vand.u32 3, %v526_v29  ;;  %vm629_vm6 = vweird.f32 %v2236_v44  ;;  %vm1046_vm7 = vcmp.lt.s32.totalorder %v1045_v30, 2 }
 0x16e   :  { %v621_v7 = vxor.u32 2147483648, %v620_v31  ;;  %v533_v28 = vxor.u32 2147483648, %v1897_v23  ;;  %v946_v37 = vsel %vm944_vm4, %v1897_v23, %v530_v26  ;;  %vm525_vm8 = vweird.f32 %v2232_v40 }
 0x16f   :  { %v1677_v1 = vmin.u32 %v811_v24, %v809_v10  ;;  %vm943_vm9 = vcmp.lt.s32.totalorder %v942_v33, 2  ;;  %vm1047_vm10 = vcmp.eq.s32.totalorder %v1045_v30, 0  ;;  %vm1050_vm11 = vcmp.eq.s32.totalorder %v1045_v30, 2 }
 0x170   :  { %v622_v16 = vsel %vm539_vm15, %v621_v7, %v620_v31  ;;  %v949_v46 = vsel %vm947_vm5, %v533_v28, %v1895_v0  ;;  %vm633_vm12 = vcmp.eq.s32.totalorder %v631_v53, 0  ;;  %vm529_vm13 = vcmp.eq.s32.totalorder %v527_v2, 0  ;;  %v2497_v31 = vld [vmem:[%s2541_s4] sm:$0x1] }
 0x171   :  { %v625_v15 = vsel %vm538_vm0, %v2236_v44, %v622_v16  ;;  %v813_v55 = vclz %v1677_v1  ;;  %v950_v5 = vsel %vm943_vm9, %v946_v37, %v949_v46  ;;  %vm636_vm14 = vcmp.eq.s32.totalorder %v631_v53, 2 }
 0x172   :  { %1898 = vcosq.f32 %v625_v15  ;;  %v531_v60 = vsel %vm529_vm13, %v1897_v23, %v530_v26  ;;  %vm532_vm15 = vcmp.eq.s32.totalorder %v527_v2, 2  ;;  %vm632_vm0 = vcmp.lt.s32.totalorder %v631_v53, 2 }
 0x173   :  { %1900 = vsinq.f32 %v625_v15  ;;  %v1678_v27 = vadd.s32 4294967294, %v813_v55  ;;  %v534_v6 = vsel %vm532_vm15, %v533_v28, %v1895_v0  ;;  %v831_v22 = vsub.s32 4, %v2457_v12 }
 0x174   :  { %1902 = vcosq.f32 %v729_v34  ;;  %vm1263_vm4 = vcmask 64512   ;;  %v951_v7 = vsel %vm525_vm8, nan, %v950_v5  ;;  %v727_v43 = vsub.s32 4, %v2369_v32 }
 0x175   :  { %vm1679_vm3 = vcmp.lt.s32.totalorder %v1678_v27, 0  ;;  %1904 = vsinq.f32 %v729_v34  ;;  %vm747_vm5 = vcmp.lt.s32.totalorder %v2243_v49, 0 }
 0x176   :  { %v816_v35 = vsel %vm1679_vm3, 0, %v1678_v27  ;;  %vm528_vm3 = vcmp.lt.s32.totalorder %v527_v2, 2  ;;  %v832_v0 = vsel %vm747_vm5, %v831_v22, %v2457_v12  ;;  %v728_v44 = vsel %vm643_vm1, %v727_v43, %v2369_v32  ;;  %v1261_v12 = vld [vmem:[%s2542_s3] sm:$0x1] }
 0x177   :  { %v817_v36 = vsub.s32 32, %v816_v35  ;;  %v821_v38 = vsub.s32 4294967266, %v816_v35  ;;  %v818_v39 = vshll.u32 %v809_v10, %v816_v35  ;;  %v535_v10 = vsel %vm528_vm3, %v531_v60, %v534_v6 }
 0x178   :  { %v536_v18 = vsel %vm525_vm8, nan, %v535_v10  ;;  %v730_v40 = vsel %vm2477_vm2, 0, %v728_v44 }
 0x179   :  { %v819_v42 = vshrl.u32 %v801_v13, %v817_v36  ;;  %v822_v54 = vadd.s32 127, %v821_v38  ;;  %v734_v33 = vadd.s32 3, %v730_v40 }
 0x17b   :  { %v820_v45 = vor.u32 %v819_v42, %v818_v39  ;;  %v823_v48 = vshll.u32 %v822_v54, 23  ;;  %v735_v27 = vand.u32 3, %v734_v33 }
 0x17c   :  { %v1899_v21 = vpop.eup %1898 }
 0x17d   :  { %v1901_v58 = vpop.eup %1900  ;;  %v637_v51 = vxor.u32 2147483648, %v1899_v21  ;;  %v824_v57 = vor.u32 4788187, %v823_v48  ;;  %v827_v4 = vcvt.s32.f32 %v820_v45  ;;  %vm737_vm13 = vcmp.eq.s32.totalorder %v735_v27, 0 }
 0x17e   :  { %v634_v52 = vxor.u32 2147483648, %v1901_v58  ;;  %v1903_v24 = vpop.eup %1902  ;;  %vm736_vm3 = vcmp.lt.s32.totalorder %v735_v27, 2 }
 0x17f   :  { %v1052_v11 = vsel %vm1050_vm11, %v637_v51, %v1901_v58  ;;  %v638_v63 = vsel %vm636_vm14, %v637_v51, %v1901_v58  ;;  %v825_v17 = vand.u32 2147483647, %v824_v57  ;;  %v1905_v55 = vpop.eup %1904  ;;  %v741_v32 = vxor.u32 2147483648, %v1903_v24 }
 0x180   :  { %v1049_v61 = vsel %vm1047_vm10, %v1899_v21, %v634_v52  ;;  %v635_v3 = vsel %vm633_vm12, %v1899_v21, %v634_v52  ;;  %v738_v26 = vxor.u32 2147483648, %v1905_v55  ;;  %vm740_vm14 = vcmp.eq.s32.totalorder %v735_v27, 2 }
 0x181   :  { %v1053_v59 = vsel %vm1046_vm7, %v1049_v61, %v1052_v11  ;;  %v639_v20 = vsel %vm632_vm0, %v635_v3, %v638_v63  ;;  %v828_v14 = vmul.f32 %v827_v4, %v825_v17  ;;  %vm746_vm7 = vcmp.le.f32.partialorder %v745_v62, 0.7853982 }
 0x182   :  { %v1054_v8 = vsel %vm629_vm6, nan, %v1053_v59  ;;  %v640_v19 = vsel %vm629_vm6, nan, %v639_v20  ;;  %v834_v9 = vsel %vm746_vm7, 0, %v832_v0  ;;  %v1148_v62 = vand.u32 3, %v730_v40 }
 0x183   :  { %1267 = vmatprep.subr.mxu0 %v1054_v8  ;;  %v829_v16 = vxor.u32 2147483648, %v828_v14  ;;  %v838_v23 = vadd.s32 3, %v834_v9  ;;  %v1251_v25 = vand.u32 3, %v834_v9  ;;  %v739_v53 = vsel %vm737_vm13, %v1903_v24, %v738_v26 }
 0x184   :  { %1268 = vmatpush1.msra.mxu0 %v951_v7  ;;  %vm1149_vm1 = vcmp.lt.s32.totalorder %v1148_v62, 2  ;;  %vm1153_vm6 = vcmp.eq.s32.totalorder %v1148_v62, 2  ;;  %vm1150_vm9 = vcmp.eq.s32.totalorder %v1148_v62, 0  ;;  %v742_v36 = vsel %vm740_vm14, %v741_v32, %v1905_v55 }
 0x185   :  { %1696 = vmatmul.mubr.msk.f32.vlgmr.msra.gmra.mrb[2].mxu0 %vm1263_vm4, %v2497_v31  ;;  %1412 = vmatprep.subr.mxu0 %v640_v19  ;;  %v830_v1 = vsel %vm747_vm5, %v829_v16, %v828_v14  ;;  %v839_v47 = vand.u32 3, %v838_v23  ;;  %vm1252_vm8 = vcmp.lt.s32.totalorder %v1251_v25, 2  ;;  %vm1253_vm2 = vcmp.eq.s32.totalorder %v1251_v25, 0 }
 0x186   :  { %1413 = vmatpush1.msra.mxu0 %v536_v18  ;;  %1476 = vmatprep.mubr.f32.mxu0 %v1917_v50  ;;  %v833_v15 = vsel %vm746_vm7, %v2243_v49, %v830_v1  ;;  %v1155_v29 = vsel %vm1153_vm6, %v741_v32, %v1905_v55  ;;  %vm1256_vm10 = vcmp.eq.s32.totalorder %v1251_v25, 2  ;;  %v1152_v34 = vsel %vm1150_vm9, %v1903_v24, %v738_v26 }
 0x187   :  { %1906 = vcosq.f32 %v833_v15  ;;  %vm841_vm11 = vcmp.eq.s32.totalorder %v839_v47, 0  ;;  %vm844_vm12 = vcmp.eq.s32.totalorder %v839_v47, 2  ;;  %v1156_v46 = vsel %vm1149_vm1, %v1152_v34, %v1155_v29 }
 0x188   :  { %1908 = vsinq.f32 %v833_v15  ;;  %vm840_vm15 = vcmp.lt.s32.totalorder %v839_v47, 2  ;;  %vm837_vm0 = vweird.f32 %v2243_v49  ;;  %vm733_vm5 = vweird.f32 %v2234_v41 }
 0x189   :  { %v743_v21 = vsel %vm736_vm3, %v739_v53, %v742_v36  ;;  %v1157_v5 = vsel %vm733_vm5, nan, %v1156_v46  ;;  %v1555_v49 = vstv %s2543_s5  ;;  %v1918_v57 = vmov 1966171168  }
 0x18a   :  { %v744_v45 = vsel %vm733_vm5, nan, %v743_v21  ;;  %v1567_v11 = vunpack.c.l.s4 %v1918_v57  ;;  %v1569_v63 = vlaneseq }
 0x18c   :  { %v1568_v6 = vunpack.c.0.s8 %v1567_v11  ;;  %v1570_v61 = vshrl.u32 %v1569_v63, 7 }
 0x18d   :  { %1698 = vmatmul.mubr.msk.f32.vlgmr.msra.gmra.mrb[2].mxu0 %vm1263_vm4, %v1261_v12 }
 0x18e   :  { %v1571_v17 = vsub.s32 %v1568_v6, %v1570_v61 }
 0x191   :  { %v1907_v28 = vpop.eup %1906 }
 0x192   :  { %v1909_v56 = vpop.eup %1908  ;;  %v845_v30 = vxor.u32 2147483648, %v1907_v28 }
 0x193   :  { %v842_v13 = vxor.u32 2147483648, %v1909_v56 }
 0x194   :  { %v1258_v35 = vsel %vm1256_vm10, %v845_v30, %v1909_v56  ;;  %v846_v37 = vsel %vm844_vm12, %v845_v30, %v1909_v56 }
 0x195   :  { %v1255_v38 = vsel %vm1253_vm2, %v1907_v28, %v842_v13  ;;  %v843_v2 = vsel %vm841_vm11, %v1907_v28, %v842_v13 }
 0x196   :  { %v1259_v39 = vsel %vm1252_vm8, %v1255_v38, %v1258_v35  ;;  %v847_v42 = vsel %vm840_vm15, %v843_v2, %v846_v37 }
 0x197   :  { %v1260_v54 = vsel %vm837_vm0, nan, %v1259_v39  ;;  %v848_v58 = vsel %vm837_vm0, nan, %v847_v42 }
 0x198   :  { %1338 = vmatprep.subr.mxu1 %v1260_v54 }
 0x199   :  { %1339 = vmatpush1.msra.mxu1 %v1157_v5 }
 0x19a   :  { %1697 = vmatmul.mubr.msk.f32.vlgmr.msra.gmra.mrb[2].mxu1 %vm1263_vm4, %v2497_v31  ;;  %1483 = vmatprep.subr.mxu1 %v848_v58 }
 0x19b   :  { %1484 = vmatpush1.msra.mxu1 %v744_v45  ;;  %1547 = vmatprep.mubr.f32.mxu1 %v1917_v50 }
 0x1a2   :  { %1699 = vmatmul.mubr.msk.f32.vlgmr.msra.gmra.mrb[2].mxu1 %vm1263_vm4, %v1261_v12  ;;  %vm1591_vm4 = vcmp.lt.s32.totalorder %v1569_v63, 512 }
 0x260   :  { %v1478_v41 = vpop.f32.mrb[2].mxu0 }
 0x261   :  { %v1556_v48 = vadd.f32 %v1555_v49, %v1478_v41  ;;  %v1480_v51 = vpop.f32.mrb[3].mxu0 }
 0x262   :  { %v1557_v52 = vadd.f32 %v1555_v49, %v1480_v51 }
 0x264   :  { %v1564_v60 = vcombine.low %v1556_v48, %v1557_v52 }
 0x266   :  { %v1572_v20 = vrot.slane %v1564_v60, %v1571_v17 }
 0x275   :  { %v1549_v3 = vpop.f32.mrb[2].mxu1 }
 0x276   :  { %v1558_v4 = vadd.f32 %v1555_v49, %v1549_v3  ;;  %v1551_v50 = vpop.f32.mrb[3].mxu1 }
 0x277   :  { %v1559_v59 = vadd.f32 %v1555_v49, %v1551_v50 }
 0x279   :  { %v1565_v8 = vcombine.low %v1558_v4, %v1559_v59 }
 0x27b   :  { %v1579_v22 = vrot.slane %v1565_v8, %v1571_v17 }
 0x27d   :  { %v1580_v31 = vcombine.low %v1572_v20, %v1579_v22 }
 0x27f   :  { %v1587_v10 = vrot.slane %v1580_v31, %v1571_v17 }
 0x281   :  { %1593 = vst.msk [vmem:[%s2544_s6] sm:$0xf] %vm1591_vm4, %v1587_v10 }

</bundles_post_ra>
